<compile_context>
chip_gen: v5e
topology: v5e:2x2
jax: 0.10.0
libtpu: 0.0.40
codegen_flags: <defaults>
</compile_context>

<pallas_src>
import jax
import jax.numpy as jnp
from jax import lax
from jax.experimental import pallas as pl
from jax.experimental.pallas import tpu as pltpu


def _frozen_bn_kernel(x_ref, scale_ref, shift_ref, o_ref):
    # x_ref / o_ref: (block_r, block_l); scale/shift: (block_r, 1) in the
    # compute dtype.  Pure streaming: o = x * scale + shift.
    o_ref[...] = (x_ref[...] * scale_ref[...] + shift_ref[...]).astype(o_ref.dtype)


def _round_up(v, m):
    return ((v + m - 1) // m) * m


def _round_down(v, m):
    return (v // m) * m


def _vmem_budgets():
    """(per-x-block byte budget, vmem_limit cap), tuned per TPU generation."""
    try:
        cap = int(pltpu.get_tpu_info().vmem_capacity_bytes)
    except Exception:
        cap = 64 << 20  # conservative fallback: assume v7x-sized VMEM
    if cap >= (100 << 20):       # v5e / v6e: 128 MiB physical VMEM
        return 12 << 20, 80 << 20
    return 8 << 20, 46 << 20     # v7x-class: 64 MiB physical VMEM


def _split_for_two_cores(block_r, block_l, grid_r, grid_l, sublane):
    """If the whole problem is a single grid step, split it so both
    TensorCores of a megacore chip get aligned, near-equal halves."""
    if grid_r * grid_l != 1:
        return block_r, block_l, grid_r, grid_l
    if block_l >= 256 and block_l % 256 == 0:
        return block_r, block_l // 2, grid_r, 2
    if block_r >= 2 * sublane and block_r % (2 * sublane) == 0:
        return block_r // 2, block_l, 2, grid_l
    return block_r, block_l, grid_r, grid_l


@jax.jit
def frozen_batch_norm_2d(x, weight, bias, running_mean, running_var):
    """FrozenBatchNorm2d forward. x: (N, C, H, W); buffers: (C,) float."""
    N, C, H, W = x.shape
    S = H * W
    R = N * C

    # Per-channel affine, folded once in float32 (PyTorch buffers are fp32).
    # NOTE: the reference module uses no epsilon, so neither do we.
    w = weight.astype(jnp.float32)
    b = bias.astype(jnp.float32)
    rm = running_mean.astype(jnp.float32)
    rv = running_var.astype(jnp.float32)
    scale_c = w * lax.rsqrt(rv)
    shift_c = b - rm * scale_c

    # Native-dtype compute for half-precision inputs (halves VALU work/vregs
    # on v6e/v7x); float32 math otherwise.  Output dtype always follows x.
    if x.dtype == jnp.bfloat16 or x.dtype == jnp.float16:
        param_dtype = x.dtype
    else:
        param_dtype = jnp.float32
    # Row r of the (N*C, S) slab corresponds to channel r % C.
    scale_r = jnp.tile(scale_c, N).reshape(R, 1).astype(param_dtype)
    shift_r = jnp.tile(shift_c, N).reshape(R, 1).astype(param_dtype)

    x2 = x.reshape(R, S)

    itemsize = jnp.dtype(x.dtype).itemsize
    p_itemsize = jnp.dtype(param_dtype).itemsize
    sublane = max(8, 32 // itemsize)     # 8 rows f32, 16 bf16, 32 int8/fp8
    p_sub = max(8, 32 // p_itemsize)

    budget, limit_cap = _vmem_budgets()

    # Rows first: as many batch*channel rows as the budget allows while
    # keeping >= 128 lanes of budget and keeping the lane-padded (rows, 1)
    # scale/shift VMEM blocks small; lanes then fill the remaining budget in
    # multiples of 128 (or full extent).
    row_cap = min(4096, max(sublane, budget // (128 * itemsize)))
    if R <= row_cap:
        block_r = R
    else:
        block_r = max(sublane, _round_down(row_cap, sublane))

    if S % 128 == 0:
        lane_budget = budget // (block_r * itemsize)
        block_l = S if S <= lane_budget else max(128, _round_down(lane_budget, 128))
    else:
        # TODO(synk): H*W not a multiple of 128 (e.g. 7x7, 14x14 feature maps)
        # forces a full-extent lane block with partially-masked stores; those
        # layers will not reach HBM roofline with this layout.
        block_l = S

    grid_r = pl.cdiv(R, block_r)
    grid_l = pl.cdiv(S, block_l)
    block_r, block_l, grid_r, grid_l = _split_for_two_cores(
        block_r, block_l, grid_r, grid_l, sublane)
    grid = (grid_r, grid_l)  # lane axis innermost: scale/shift stay resident

    x_spec = pl.BlockSpec((block_r, block_l), lambda r, s: (r, s))
    ch_spec = pl.BlockSpec((block_r, 1), lambda r, s: (r, 0))

    # VMEM: double-buffered x in + out blocks, plus the lane-padded (rows, 1)
    # scale/shift blocks, plus slack; clamped to a per-generation cap but
    # never below what the chosen blocks actually need.
    big = 2 * 2 * block_r * block_l * itemsize
    small = 2 * 2 * _round_up(block_r, p_sub) * 128 * p_itemsize
    vmem_limit = min(max(big + small + (4 << 20), 16 << 20), limit_cap)
    if big + small + (2 << 20) > vmem_limit:
        vmem_limit = big + small + (2 << 20)

    cost = pl.CostEstimate(
        flops=2 * N * C * S,
        transcendentals=0,
        bytes_accessed=2 * N * C * S * itemsize + 2 * R * p_itemsize,
    )

    out2 = pl.pallas_call(
        _frozen_bn_kernel,
        out_shape=jax.ShapeDtypeStruct((R, S), x.dtype),
        grid_spec=pltpu.PrefetchScalarGridSpec(
            num_scalar_prefetch=0,
            grid=grid,
            in_specs=[x_spec, ch_spec, ch_spec],
            out_specs=x_spec,
        ),
        compiler_params=pltpu.CompilerParams(
            dimension_semantics=("parallel", "parallel"),
            vmem_limit_bytes=vmem_limit,
        ),
        cost_estimate=cost,
    )(x2, scale_r, shift_r)

    return out2.reshape(N, C, H, W)


def _reference(x, weight, bias, running_mean, running_var):
    w = weight.reshape(1, -1, 1, 1).astype(jnp.float32)
    b = bias.reshape(1, -1, 1, 1).astype(jnp.float32)
    rv = running_var.reshape(1, -1, 1, 1).astype(jnp.float32)
    rm = running_mean.reshape(1, -1, 1, 1).astype(jnp.float32)
    scale = w * lax.rsqrt(rv)
    shift = b - rm * scale
    return x.astype(jnp.float32) * scale + shift


if __name__ == "__main__":
    key = jax.random.PRNGKey(0)
    kx, kw, kb, km, kv = jax.random.split(key, 5)

    # Primary test: lane-dense spatial plane (16*16 = 256), float32.
    N, C, H, W = 2, 4, 16, 16
    x = jax.random.normal(kx, (N, C, H, W), dtype=jnp.float32)
    weight = jax.random.normal(kw, (C,), dtype=jnp.float32)
    bias = jax.random.normal(kb, (C,), dtype=jnp.float32)
    running_mean = jax.random.normal(km, (C,), dtype=jnp.float32)
    running_var = jnp.abs(jax.random.normal(kv, (C,), dtype=jnp.float32)) + 0.5

    out = jax.block_until_ready(
        frozen_batch_norm_2d(x, weight, bias, running_mean, running_var))
    ref = _reference(x, weight, bias, running_mean, running_var)
    assert out.shape == (N, C, H, W)
    assert jnp.allclose(out, ref, atol=1e-5, rtol=1e-5)

    # Secondary test: non-lane-dense spatial plane (7*7 = 49), float32 path.
    N2, C2, H2, W2 = 2, 8, 7, 7
    x_s = jax.random.normal(kx, (N2, C2, H2, W2), dtype=jnp.float32)
    w_s = jax.random.normal(kw, (C2,), dtype=jnp.float32)
    b_s = jax.random.normal(kb, (C2,), dtype=jnp.float32)
    m_s = jax.random.normal(km, (C2,), dtype=jnp.float32)
    v_s = jnp.abs(jax.random.normal(kv, (C2,), dtype=jnp.float32)) + 0.5
    out_s = jax.block_until_ready(
        frozen_batch_norm_2d(x_s, w_s, b_s, m_s, v_s))
    assert jnp.allclose(out_s, _reference(x_s, w_s, b_s, m_s, v_s),
                        atol=1e-5, rtol=1e-5)

    # Tertiary test: native bf16 compute path (looser tolerance vs f32 ref).
    x_h = x.astype(jnp.bfloat16)
    out_h = jax.block_until_ready(
        frozen_batch_norm_2d(x_h, weight, bias, running_mean, running_var))
    ref_h = _reference(x_h.astype(jnp.float32), weight, bias,
                       running_mean, running_var)
    assert out_h.dtype == jnp.bfloat16
    assert jnp.allclose(out_h.astype(jnp.float32), ref_h, atol=0.25, rtol=5e-2)

    print("KERNEL_OK")
</pallas_src>

<mosaic_0001>
module attributes {stable_mosaic.version = 11 : i64} {
  func.func @_frozen_bn_kernel(%arg0: i32, %arg1: i32, %arg2: memref<8x128xf32, #tpu.memory_space<vmem>>, %arg3: memref<8x1xf32, #tpu.memory_space<vmem>>, %arg4: memref<8x1xf32, #tpu.memory_space<vmem>>, %arg5: memref<8x128xf32, #tpu.memory_space<vmem>>) attributes {dimension_semantics = [#tpu.dimension_semantics<parallel>, #tpu.dimension_semantics<parallel>], iteration_bounds = array<i64: 1, 2>, scalar_prefetch = 0 : i64, scratch_operands = 0 : i64, tpu.core_type = #tpu.core_type<tc>, window_params = [{transform_indices = @transform_0, window_bounds = array<i64: 8, 128>}, {transform_indices = @transform_1, window_bounds = array<i64: 8, 1>}, {transform_indices = @transform_2, window_bounds = array<i64: 8, 1>}, {transform_indices = @transform_3, window_bounds = array<i64: 8, 128>}]} {
    %c0 = arith.constant 0 : index
    %c0_0 = arith.constant 0 : index
    %0 = vector.load %arg2[%c0, %c0_0] : memref<8x128xf32, #tpu.memory_space<vmem>>, vector<8x128xf32>
    %c0_1 = arith.constant 0 : index
    %c0_2 = arith.constant 0 : index
    %1 = vector.load %arg3[%c0_1, %c0_2] : memref<8x1xf32, #tpu.memory_space<vmem>>, vector<8x1xf32>
    %2 = vector.broadcast %1 : vector<8x1xf32> to vector<8x128xf32>
    %3 = arith.mulf %0, %2 : vector<8x128xf32>
    %c0_3 = arith.constant 0 : index
    %c0_4 = arith.constant 0 : index
    %4 = vector.load %arg4[%c0_3, %c0_4] : memref<8x1xf32, #tpu.memory_space<vmem>>, vector<8x1xf32>
    %5 = vector.broadcast %4 : vector<8x1xf32> to vector<8x128xf32>
    %6 = arith.addf %3, %5 : vector<8x128xf32>
    %c0_5 = arith.constant 0 : index
    %c0_6 = arith.constant 0 : index
    %7 = vector.load %arg5[%c0_5, %c0_6] : memref<8x128xf32, #tpu.memory_space<vmem>>, vector<8x128xf32>
    tpu.vector_store %arg5[%c0_5, %c0_6], %6 {strides = array<i32>} : memref<8x128xf32, #tpu.memory_space<vmem>>, vector<8x128xf32>,
    return
  }
  func.func @transform_0(%arg0: i32, %arg1: i32) -> (i32, i32) {
    %c0_i32 = arith.constant 0 : i32
    return %arg0, %arg1 : i32, i32
  }
  func.func @transform_1(%arg0: i32, %arg1: i32) -> (i32, i32) {
    %c0_i32 = arith.constant 0 : i32
    %c0_i32_0 = arith.constant 0 : i32
    return %arg0, %c0_i32 : i32, i32
  }
  func.func @transform_2(%arg0: i32, %arg1: i32) -> (i32, i32) {
    %c0_i32 = arith.constant 0 : i32
    %c0_i32_0 = arith.constant 0 : i32
    return %arg0, %c0_i32 : i32, i32
  }
  func.func @transform_3(%arg0: i32, %arg1: i32) -> (i32, i32) {
    %c0_i32 = arith.constant 0 : i32
    return %arg0, %arg1 : i32, i32
  }
}

</mosaic_0001>

<bundles_post_ra>
// kernel: tile.0
= control target key start
LH: loop header
LB: loop body
LE: loop exit
PB: predicated region body
PF: predicated region fallthrough
CT: control target
= control target key end

     0   :  { %s34_s8 = smov 125   ;;  %s35_s9 = smov 126   ;;  %vm7_vm0 = vcmask 7168   ;;  %s61_s0 = inlined_call_operand.vmem [shape: f32[2,4], index: 0, kind: input, shape index: {}]   ;;  %s62_s1 = inlined_call_operand.vmem [shape: f32[8,1], index: 1, kind: output, shape index: {}]  }
   0x1   :  { %v4_v0 = vld [vmem:[%s61_s0] sm:$0x3]  ;;  %s33_s0 = smov 127  }
   0x2   :  { %5 = vst [vmem:[#allocation0] sm:$0x3] %v4_v0 }
   0x9   :  { %v9_v1 = vld [vmem:[#allocation0] sm:$0x3]  }
   0xa   :  { %v21_v2 = vld [vmem:[#allocation0] sm:$0x3]   ;;  %10 = vrot.lane.b32.xlu0 %v9_v1, %s33_s0 }
   0xb   :  { %22 = vrot.lane.b32.xlu1 %v21_v2, %s34_s8  ;;  %v15_v3 = vld [vmem:[#allocation0] sm:$0x3]  }
   0xc   :  { %v6_v4 = vld [vmem:[#allocation0] sm:$0x3]  }
   0xd   :  { %8 = vst.msk [vmem:[%s62_s1] ss:$4 sm:$0x3] %vm7_vm0, %v6_v4  }
  0x12   :  { %16 = vrot.lane.b32.xlu0 %v15_v3, %s35_s9 }
  0x7c   :  { %v11_v5 = vpop.permute.xlu0 %10  }
  0x7d   :  { %v23_v6 = vpop.permute.xlu1 %22   ;;  %27 = vst.msk [vmem:[%s62_s1 + $0x1] ss:$4 sm:$0x3] %vm7_vm0, %v11_v5  }
  0x7e   :  { %29 = vst.msk [vmem:[%s62_s1 + $0x3] ss:$4 sm:$0x3] %vm7_vm0, %v23_v6  }
  0x84   :  { %v17_v7 = vpop.permute.xlu0 %16  }
  0x85   :  { %28 = vst.msk [vmem:[%s62_s1 + $0x2] ss:$4 sm:$0x3] %vm7_vm0, %v17_v7  }

// kernel: tile.18
= control target key start
LH: loop header
LB: loop body
LE: loop exit
PB: predicated region body
PF: predicated region fallthrough
CT: control target
= control target key end

     0   :  { %s22_s0 = inlined_call_operand.vmem [shape: f32[4], index: 0, kind: input, shape index: {}]   ;;  %s23_s1 = inlined_call_operand.vmem [shape: f32[2,4], index: 1, kind: output, shape index: {}]  }
   0x1   :  { %v4_v0 = vld [vmem:[%s22_s0] ss:$0 sm:$0xff] }
   0x2   :  { %5 = vst [vmem:[%s23_s1] sm:$0x3] %v4_v0 }

// kernel: frozen_batch_norm_2d.1
= control target key start
LH: loop header
LB: loop body
LE: loop exit
PB: predicated region body
PF: predicated region fallthrough
CT: control target
= control target key end

     0   :  { %s448_s12 = smov 0   ;;  %s450_s13 = smov 0   ;;  %s480_s0 = inlined_call_operand.vmem [shape: f32[8,256], index: 0, kind: input, shape index: {}]   ;;  %s481_s1 = inlined_call_operand.vmem [shape: f32[8,1], index: 1, kind: input, shape index: {}]   ;;  %s482_s2 = inlined_call_operand.vmem [shape: f32[8,1], index: 2, kind: input, shape index: {}]   ;;  %s483_s3 = inlined_call_operand.vmem [shape: f32[8,256], index: 3, kind: output, shape index: {}]  }
   0x1   :  { %s452_s14 = smov 0  }
   0x2 LB: > { %s22_s15 = sadd.s32 1, %s421_s13  ;;  %p372_p0 = scmp.ge.s32.totalorder %s425_s14, 1  ;;  %s425_s14 = sphi %s452_s14, %s13_s14   ;;  %s421_s13 = sphi %s450_s13, %s485_s13   ;;  %s417_s12 = sphi %s448_s12, %s484_s12  }
   0x3   : > { %p23_p1 = scmp.ge.s32.totalorder %s22_s15, 2  ;;  %p174_p2 = scmp.lt.s32.totalorder %s425_s14, 3 }
   0x5   : > { %s487_s15 = smov (%p23_p1, %s22_s15), 0  ;;  %p175_p3 = pnand %p372_p0, %p174_p2 }
   0x6   : > { %p214_p4 = scmp.lt.s32.totalorder (!%p175_p3), %s417_s12, 1 }
   0x7   : > { %178 = sbr.rel (%p175_p3) target bundleno = 140 (0x8c), region = 32 }
   0xc   : > { %v237_v0 = vld [vmem:[%s481_s1] sm:$0xff]  ;;  %v427_v1 = vmov 0   ;;  %s489_s12 = smov (!%p214_p4, %s417_s12), 1 }
   0xd   : > { %402 = vset.pattern.permute.xlu0 %v427_v1  ;;  %v244_v2 = vld [vmem:[%s482_s2] sm:$0xff]  ;;  %s373_s20 = sshll.u32 %s489_s12, 3 }
   0xe   : > { %240 = vperm.xlu0 %402, %v237_v0   ;;  %s219_s23 = scalar_lea.vmem %s480_s0, %s373_s20  ;;  %s235_s26 = scalar_lea.vmem %s483_s3, %s373_s20 }
   0xf   : > { %v236_v4 = vld [vmem:[%s219_s23] sm:$0xff] }
  0x16   : > { %247 = vperm.xlu0 %402, %v244_v2  }
  0x80   : > { %v241_v3 = vpop.permute.xlu0 %240 }
  0x81   : > { %v243_v5 = vmul.f32 %v241_v3, %v236_v4 }
  0x88   : > { %v248_v6 = vpop.permute.xlu0 %247 }
  0x89   : > { %v250_v7 = vadd.f32 %v248_v6, %v243_v5 }
  0x8b   : > { %251 = vst [vmem:[%s235_s26] sm:$0xff] %v250_v7 }
  0x8c PF: > { %s13_s14 = sadd.s32 1, %s425_s14   ;;  %s484_s12 = smov %s421_s13 }
  0x8d   : > { %p10_p5 = scmp.ge.s32.totalorder %s13_s14, 4   ;;  %s485_s13 = smov %s487_s15 }
  0x8f   :  { %12 = sbr.rel (!%p10_p5) target bundleno = 2 (0x2), region = 68 }

</bundles_post_ra>
